<compile_context>
chip_gen: v6e
topology: v6e:2x2x1
jax: 0.10.0
libtpu: 0.0.40
codegen_flags: <defaults>
</compile_context>

<pallas_src>
import functools

import jax
import jax.numpy as jnp
from jax.experimental import pallas as pl
from jax.experimental.pallas import tpu as pltpu

_LANES = 128
_TILE_BYTES = 2 << 20   # per-input, per-pipeline-buffer VMEM budget (2 MiB)
_CHUNK_ROWS = 256       # in-kernel strip-mine granularity (vreg-pressure control)
_NCORES = 2             # leading "parallel" grid axis (v7x: 2 TCs; serial elsewhere)


def _round_up(x, m):
    return ((x + m - 1) // m) * m


def _sublane_multiple(dtype):
    # f32 -> 8, bf16/f16 -> 16, int8/fp8 -> 32 (packed-dtype sublane rule).
    return max(8, 32 // jnp.dtype(dtype).itemsize)


def _tile_plan(rows, dtype):
    """Return (tile_rows, chunk_rows, num_tiles) for a (rows, 128) operand."""
    sub = _sublane_multiple(dtype)
    chunk = min(_CHUNK_ROWS, _round_up(rows, sub))
    max_rows = _TILE_BYTES // (_LANES * jnp.dtype(dtype).itemsize)
    tile = min(max_rows, _round_up(rows, chunk))          # always a multiple of chunk
    return tile, chunk, pl.cdiv(rows, tile)


def _tile_lane_sum(p_ref, g_ref, *, tile_rows, chunk_rows, valid_rows):
    """Per-lane sum of (p-g)^2 over `valid_rows` rows of the tile -> (1, 128) f32.

    Strip-mined into `chunk_rows`-row chunks with static slice bounds so the
    elementwise intermediates stay a few dozen vregs.  Chunks entirely past
    `valid_rows` are not emitted; only the single straddling chunk (partial
    last tile) pays the iota/compare/select mask.
    """
    total = jnp.zeros((1, _LANES), jnp.float32)
    for c in range(tile_rows // chunk_rows):
        r0 = c * chunk_rows
        if r0 >= valid_rows:          # static: trailing chunks contribute nothing
            break
        d = (p_ref[pl.ds(r0, chunk_rows), :].astype(jnp.float32)
             - g_ref[pl.ds(r0, chunk_rows), :].astype(jnp.float32))
        dd = d * d
        if r0 + chunk_rows > valid_rows:   # static: only the boundary chunk masks
            row_ids = jax.lax.broadcasted_iota(jnp.int32, dd.shape, 0)
            dd = jnp.where(row_ids < (valid_rows - r0), dd, jnp.float32(0.0))
        total = total + jnp.sum(dd, axis=0, keepdims=True)
    return total


def _mse_multi_kernel(p1_ref, g1_ref, p2_ref, g2_ref, acc1_ref, acc2_ref, *,
                      steps_per_core, tiles1, tiles2,
                      tile_rows1, tile_rows2, chunk_rows1, chunk_rows2,
                      rows1, rows2):
    c = pl.program_id(0)            # core / parallel axis
    i = pl.program_id(1)            # reduction axis (arbitrary)
    t = c * steps_per_core + i      # global tile index

    @pl.when(i == 0)
    def _init():
        acc1_ref[...] = jnp.zeros_like(acc1_ref)
        acc2_ref[...] = jnp.zeros_like(acc2_ref)

    def accumulate(p_ref, g_ref, acc_ref, tiles, tile_rows, chunk_rows, rows):
        last_valid = rows - (tiles - 1) * tile_rows   # static rows in the last tile
        if last_valid == tile_rows:
            # Every real tile is full: no mask anywhere; clamped steps skipped.
            @pl.when(t < tiles)
            def _():
                acc_ref[...] += _tile_lane_sum(
                    p_ref, g_ref, tile_rows=tile_rows,
                    chunk_rows=chunk_rows, valid_rows=tile_rows)
        else:
            if tiles > 1:
                @pl.when(t < tiles - 1)
                def _():
                    acc_ref[...] += _tile_lane_sum(
                        p_ref, g_ref, tile_rows=tile_rows,
                        chunk_rows=chunk_rows, valid_rows=tile_rows)

            @pl.when(t == tiles - 1)
            def _():
                acc_ref[...] += _tile_lane_sum(
                    p_ref, g_ref, tile_rows=tile_rows,
                    chunk_rows=chunk_rows, valid_rows=last_valid)

    accumulate(p1_ref, g1_ref, acc1_ref, tiles1, tile_rows1, chunk_rows1, rows1)
    accumulate(p2_ref, g2_ref, acc2_ref, tiles2, tile_rows2, chunk_rows2, rows2)


def _rows_view(x):
    """(body, tail, n): body is a free-bitcast (rows, 128) prefix view, tail is
    the <128-element remainder (or None).  No jnp.pad (it would materialise a
    full extra HBM copy of the tensor)."""
    flat = x.reshape(-1)
    n = flat.shape[0]
    rem = n % _LANES
    main = n - rem
    if main == 0:
        return None, flat, n
    if rem == 0:
        return flat.reshape(main // _LANES, _LANES), None, n   # pure bitcast
    # TODO(synk): a fully zero-copy path for non-128-multiple element counts
    # would need manual DMA (memory_space=pl.ANY); the static prefix slice
    # below may cost one extra copy for this (rare) case.
    return flat[:main].reshape(main // _LANES, _LANES), flat[main:], n


def _sq_diff_sum(p, g):
    if p is None:
        return jnp.float32(0.0)
    d = p.astype(jnp.float32) - g.astype(jnp.float32)
    return jnp.sum(d * d)


@functools.partial(jax.jit, static_argnames=("c2_weight",))
def mse_multi(c1_pred, c1_gt, c2_pred, c2_gt, c2_weight):
    """Pallas equivalent of MSE_Multi.forward."""
    assert c1_pred.shape == c1_gt.shape, "MSELoss requires matching shapes"
    assert c2_pred.shape == c2_gt.shape, "MSELoss requires matching shapes"

    p1, p1_tail, n1 = _rows_view(c1_pred)
    g1, g1_tail, _ = _rows_view(c1_gt)
    p2, p2_tail, n2 = _rows_view(c2_pred)
    g2, g2_tail, _ = _rows_view(c2_gt)

    if p1 is None or p2 is None:
        # A tensor with < 128 elements would give the fused kernel an empty
        # operand; such inputs are tiny, so compute both terms in plain XLA.
        sq1 = _sq_diff_sum(c1_pred.reshape(-1), c1_gt.reshape(-1))
        sq2 = _sq_diff_sum(c2_pred.reshape(-1), c2_gt.reshape(-1))
        return sq1 / jnp.float32(n1) + jnp.float32(c2_weight) * (sq2 / jnp.float32(n2))

    rows1, rows2 = p1.shape[0], p2.shape[0]
    tr1, ch1, tiles1 = _tile_plan(rows1, p1.dtype)
    tr2, ch2, tiles2 = _tile_plan(rows2, p2.dtype)
    steps = pl.cdiv(max(tiles1, tiles2), _NCORES)

    def in_spec(tile_rows, num_tiles):
        def index_map(c, i):
            # Clamp so grid steps past this tensor's extent reuse the previous
            # block index -> the pipeline skips the redundant DMA (the kernel
            # skips the compute via pl.when).
            return (jnp.minimum(c * steps + i, num_tiles - 1), 0)
        return pl.BlockSpec((tile_rows, _LANES), index_map)

    acc_spec = pl.BlockSpec((None, 1, _LANES), lambda c, i: (c, 0, 0))
    acc_shape = jax.ShapeDtypeStruct((_NCORES, 1, _LANES), jnp.float32)

    kernel = functools.partial(
        _mse_multi_kernel,
        steps_per_core=steps,
        tiles1=tiles1, tiles2=tiles2,
        tile_rows1=tr1, tile_rows2=tr2,
        chunk_rows1=ch1, chunk_rows2=ch2,
        rows1=rows1, rows2=rows2)

    # VMEM budget: 2 pipeline buffers per input + headroom for in-kernel
    # temporaries / internal scratch.  Cap well below v7x's 64 MiB physical.
    isz = lambda a: jnp.dtype(a.dtype).itemsize
    buf_bytes = 2 * _LANES * (tr1 * (isz(p1) + isz(g1)) + tr2 * (isz(p2) + isz(g2)))
    vmem_limit = int(min(48 << 20, buf_bytes + (16 << 20)))

    total_bytes = (c1_pred.size * isz(c1_pred) + c1_gt.size * isz(c1_gt)
                   + c2_pred.size * isz(c2_pred) + c2_gt.size * isz(c2_gt))
    cost = pl.CostEstimate(flops=3 * (n1 + n2), transcendentals=0,
                           bytes_accessed=int(total_bytes))

    acc1, acc2 = pl.pallas_call(
        kernel,
        out_shape=(acc_shape, acc_shape),
        grid_spec=pltpu.PrefetchScalarGridSpec(
            num_scalar_prefetch=0,
            grid=(_NCORES, steps),
            in_specs=[in_spec(tr1, tiles1), in_spec(tr1, tiles1),
                      in_spec(tr2, tiles2), in_spec(tr2, tiles2)],
            out_specs=[acc_spec, acc_spec]),
        compiler_params=pltpu.CompilerParams(
            # TODO(synk): verify on a v7x xprof trace that this axis actually
            # shards across the two TensorCores; if not, switch to
            # pltpu.CORE_PARALLEL / pl.core_map (kept plain "parallel" here so
            # the same kernel stays valid on single-TC v5e/v6e).
            dimension_semantics=("parallel", "arbitrary"),
            vmem_limit_bytes=vmem_limit),
        cost_estimate=cost,
    )(p1, g1, p2, g2)

    # Single cheap cross-lane reduction + <128-element tails + normalization.
    sq1 = jnp.sum(acc1) + _sq_diff_sum(p1_tail, g1_tail)
    sq2 = jnp.sum(acc2) + _sq_diff_sum(p2_tail, g2_tail)
    return sq1 / jnp.float32(n1) + jnp.float32(c2_weight) * (sq2 / jnp.float32(n2))


if __name__ == "__main__":
    # Deterministic "parameter" from __init__: c2_weight
    C2_WEIGHT = 0.5

    keys = jax.random.split(jax.random.PRNGKey(0), 8)

    # Small NCHW-like shapes; the two loss terms may have different shapes.
    c1_pred = jax.random.normal(keys[0], (2, 4, 16, 16), dtype=jnp.float32)
    c1_gt = jax.random.normal(keys[1], (2, 4, 16, 16), dtype=jnp.float32)
    c2_pred = jax.random.normal(keys[2], (2, 8, 8, 8), dtype=jnp.float32)
    c2_gt = jax.random.normal(keys[3], (2, 8, 8, 8), dtype=jnp.float32)

    loss = mse_multi(c1_pred, c1_gt, c2_pred, c2_gt, C2_WEIGHT)
    jax.block_until_ready(loss)
    ref = jnp.mean((c1_pred - c1_gt) ** 2) + C2_WEIGHT * jnp.mean((c2_pred - c2_gt) ** 2)
    assert jnp.allclose(loss, ref, rtol=1e-5, atol=1e-5), (loss, ref)

    # Second check: non-multiple-of-128 / non-multiple-of-8 row counts, which
    # exercise the in-kernel partial-tile mask and the JAX tail path (no pad).
    x1p = jax.random.normal(keys[4], (19, 128), dtype=jnp.float32)
    x1g = jax.random.normal(keys[5], (19, 128), dtype=jnp.float32)
    x2p = jax.random.normal(keys[6], (5, 160), dtype=jnp.float32)
    x2g = jax.random.normal(keys[7], (5, 160), dtype=jnp.float32)
    loss2 = mse_multi(x1p, x1g, x2p, x2g, C2_WEIGHT)
    jax.block_until_ready(loss2)
    ref2 = jnp.mean((x1p - x1g) ** 2) + C2_WEIGHT * jnp.mean((x2p - x2g) ** 2)
    assert jnp.allclose(loss2, ref2, rtol=1e-5, atol=1e-5), (loss2, ref2)

    print("KERNEL_OK")
</pallas_src>

<mosaic_0001>
module attributes {stable_mosaic.version = 11 : i64} {
  func.func @_mse_multi_kernel(%arg0: i32, %arg1: i32, %arg2: memref<16x128xf32, #tpu.memory_space<vmem>>, %arg3: memref<16x128xf32, #tpu.memory_space<vmem>>, %arg4: memref<8x128xf32, #tpu.memory_space<vmem>>, %arg5: memref<8x128xf32, #tpu.memory_space<vmem>>, %arg6: memref<1x1x128xf32, #tpu.memory_space<vmem>>, %arg7: memref<1x1x128xf32, #tpu.memory_space<vmem>>) attributes {dimension_semantics = [#tpu.dimension_semantics<parallel>, #tpu.dimension_semantics<arbitrary>], iteration_bounds = array<i64: 2, 1>, scalar_prefetch = 0 : i64, scratch_operands = 0 : i64, tpu.core_type = #tpu.core_type<tc>, window_params = [{transform_indices = @transform_0, window_bounds = array<i64: 16, 128>}, {transform_indices = @transform_1, window_bounds = array<i64: 16, 128>}, {transform_indices = @transform_2, window_bounds = array<i64: 8, 128>}, {transform_indices = @transform_3, window_bounds = array<i64: 8, 128>}, {transform_indices = @transform_4, window_bounds = array<i64: 1, 1, 128>}, {transform_indices = @transform_5, window_bounds = array<i64: 1, 1, 128>}]} {
    %c1_i32 = arith.constant 1 : i32
    %0 = arith.muli %arg0, %c1_i32 : i32
    %1 = arith.addi %0, %arg1 : i32
    %c0_i32 = arith.constant 0 : i32
    %2 = arith.cmpi eq, %arg1, %c0_i32 : i32
    %3 = arith.extui %2 : i1 to i32
    %c0_i32_0 = arith.constant 0 : i32
    %4 = arith.cmpi ne, %3, %c0_i32_0 : i32
    scf.if %4 {
      %cst = arith.constant 0.000000e+00 : f32
      %11 = vector.broadcast %cst : f32 to vector<1x128xf32>
      %c0 = arith.constant 0 : index
      %c0_5 = arith.constant 0 : index
      %c0_6 = arith.constant 0 : index
      %12 = vector.load %arg6[%c0, %c0_5, %c0_6] : memref<1x1x128xf32, #tpu.memory_space<vmem>>, vector<1x1x128xf32>
      %13 = vector.shape_cast %12 : vector<1x1x128xf32> to vector<1x128xf32>
      %14 = vector.shape_cast %11 : vector<1x128xf32> to vector<1x1x128xf32>
      tpu.vector_store %arg6[%c0, %c0_5, %c0_6], %14 {strides = array<i32>} : memref<1x1x128xf32, #tpu.memory_space<vmem>>, vector<1x1x128xf32>,
      %cst_7 = arith.constant 0.000000e+00 : f32
      %15 = vector.broadcast %cst_7 : f32 to vector<1x128xf32>
      %c0_8 = arith.constant 0 : index
      %c0_9 = arith.constant 0 : index
      %c0_10 = arith.constant 0 : index
      %16 = vector.load %arg7[%c0_8, %c0_9, %c0_10] : memref<1x1x128xf32, #tpu.memory_space<vmem>>, vector<1x1x128xf32>
      %17 = vector.shape_cast %16 : vector<1x1x128xf32> to vector<1x128xf32>
      %18 = vector.shape_cast %15 : vector<1x128xf32> to vector<1x1x128xf32>
      tpu.vector_store %arg7[%c0_8, %c0_9, %c0_10], %18 {strides = array<i32>} : memref<1x1x128xf32, #tpu.memory_space<vmem>>, vector<1x1x128xf32>,
    } else {
    }
    %c1_i32_1 = arith.constant 1 : i32
    %5 = arith.cmpi slt, %1, %c1_i32_1 : i32
    %6 = arith.extui %5 : i1 to i32
    %c0_i32_2 = arith.constant 0 : i32
    %7 = arith.cmpi ne, %6, %c0_i32_2 : i32
    scf.if %7 {
      %c0 = arith.constant 0 : index
      %c0_5 = arith.constant 0 : index
      %c0_6 = arith.constant 0 : index
      %11 = vector.load %arg6[%c0, %c0_5, %c0_6] : memref<1x1x128xf32, #tpu.memory_space<vmem>>, vector<1x1x128xf32>
      %12 = vector.shape_cast %11 : vector<1x1x128xf32> to vector<1x128xf32>
      %cst = arith.constant 0.000000e+00 : f32
      %13 = vector.broadcast %cst : f32 to vector<1x128xf32>
      %c0_7 = arith.constant 0 : index
      %c0_8 = arith.constant 0 : index
      %14 = vector.load %arg2[%c0_7, %c0_8] : memref<16x128xf32, #tpu.memory_space<vmem>>, vector<16x128xf32>
      %c0_9 = arith.constant 0 : index
      %c0_10 = arith.constant 0 : index
      %15 = vector.load %arg3[%c0_9, %c0_10] : memref<16x128xf32, #tpu.memory_space<vmem>>, vector<16x128xf32>
      %16 = arith.subf %14, %15 : vector<16x128xf32>
      %17 = arith.mulf %16, %16 : vector<16x128xf32>
      %cst_11 = arith.constant dense<0.000000e+00> : vector<128xf32>
      %18 = vector.multi_reduction <add>, %17, %cst_11 [0] : vector<16x128xf32> to vector<128xf32>
      %19 = vector.shape_cast %18 : vector<128xf32> to vector<1x128xf32>
      %20 = arith.addf %13, %19 : vector<1x128xf32>
      %21 = arith.addf %12, %20 : vector<1x128xf32>
      %c0_12 = arith.constant 0 : index
      %c0_13 = arith.constant 0 : index
      %c0_14 = arith.constant 0 : index
      %22 = vector.load %arg6[%c0_12, %c0_13, %c0_14] : memref<1x1x128xf32, #tpu.memory_space<vmem>>, vector<1x1x128xf32>
      %23 = vector.shape_cast %22 : vector<1x1x128xf32> to vector<1x128xf32>
      %24 = vector.shape_cast %21 : vector<1x128xf32> to vector<1x1x128xf32>
      tpu.vector_store %arg6[%c0_12, %c0_13, %c0_14], %24 {strides = array<i32>} : memref<1x1x128xf32, #tpu.memory_space<vmem>>, vector<1x1x128xf32>,
    } else {
    }
    %c1_i32_3 = arith.constant 1 : i32
    %8 = arith.cmpi slt, %1, %c1_i32_3 : i32
    %9 = arith.extui %8 : i1 to i32
    %c0_i32_4 = arith.constant 0 : i32
    %10 = arith.cmpi ne, %9, %c0_i32_4 : i32
    scf.if %10 {
      %c0 = arith.constant 0 : index
      %c0_5 = arith.constant 0 : index
      %c0_6 = arith.constant 0 : index
      %11 = vector.load %arg7[%c0, %c0_5, %c0_6] : memref<1x1x128xf32, #tpu.memory_space<vmem>>, vector<1x1x128xf32>
      %12 = vector.shape_cast %11 : vector<1x1x128xf32> to vector<1x128xf32>
      %cst = arith.constant 0.000000e+00 : f32
      %13 = vector.broadcast %cst : f32 to vector<1x128xf32>
      %c0_7 = arith.constant 0 : index
      %c0_8 = arith.constant 0 : index
      %14 = vector.load %arg4[%c0_7, %c0_8] : memref<8x128xf32, #tpu.memory_space<vmem>>, vector<8x128xf32>
      %c0_9 = arith.constant 0 : index
      %c0_10 = arith.constant 0 : index
      %15 = vector.load %arg5[%c0_9, %c0_10] : memref<8x128xf32, #tpu.memory_space<vmem>>, vector<8x128xf32>
      %16 = arith.subf %14, %15 : vector<8x128xf32>
      %17 = arith.mulf %16, %16 : vector<8x128xf32>
      %cst_11 = arith.constant dense<0.000000e+00> : vector<128xf32>
      %18 = vector.multi_reduction <add>, %17, %cst_11 [0] : vector<8x128xf32> to vector<128xf32>
      %19 = vector.shape_cast %18 : vector<128xf32> to vector<1x128xf32>
      %20 = arith.addf %13, %19 : vector<1x128xf32>
      %21 = arith.addf %12, %20 : vector<1x128xf32>
      %c0_12 = arith.constant 0 : index
      %c0_13 = arith.constant 0 : index
      %c0_14 = arith.constant 0 : index
      %22 = vector.load %arg7[%c0_12, %c0_13, %c0_14] : memref<1x1x128xf32, #tpu.memory_space<vmem>>, vector<1x1x128xf32>
      %23 = vector.shape_cast %22 : vector<1x1x128xf32> to vector<1x128xf32>
      %24 = vector.shape_cast %21 : vector<1x128xf32> to vector<1x1x128xf32>
      tpu.vector_store %arg7[%c0_12, %c0_13, %c0_14], %24 {strides = array<i32>} : memref<1x1x128xf32, #tpu.memory_space<vmem>>, vector<1x1x128xf32>,
    } else {
    }
    return
  }
  func.func @transform_0(%arg0: i32, %arg1: i32) -> (i32, i32) {
    %c1_i32 = arith.constant 1 : i32
    %0 = arith.muli %arg0, %c1_i32 : i32
    %1 = arith.addi %0, %arg1 : i32
    %c0_i32 = arith.constant 0 : i32
    %2 = arith.minsi %1, %c0_i32 : i32
    %c0_i32_0 = arith.constant 0 : i32
    %c0_i32_1 = arith.constant 0 : i32
    return %2, %c0_i32_0 : i32, i32
  }
  func.func @transform_1(%arg0: i32, %arg1: i32) -> (i32, i32) {
    %c1_i32 = arith.constant 1 : i32
    %0 = arith.muli %arg0, %c1_i32 : i32
    %1 = arith.addi %0, %arg1 : i32
    %c0_i32 = arith.constant 0 : i32
    %2 = arith.minsi %1, %c0_i32 : i32
    %c0_i32_0 = arith.constant 0 : i32
    %c0_i32_1 = arith.constant 0 : i32
    return %2, %c0_i32_0 : i32, i32
  }
  func.func @transform_2(%arg0: i32, %arg1: i32) -> (i32, i32) {
    %c1_i32 = arith.constant 1 : i32
    %0 = arith.muli %arg0, %c1_i32 : i32
    %1 = arith.addi %0, %arg1 : i32
    %c0_i32 = arith.constant 0 : i32
    %2 = arith.minsi %1, %c0_i32 : i32
    %c0_i32_0 = arith.constant 0 : i32
    %c0_i32_1 = arith.constant 0 : i32
    return %2, %c0_i32_0 : i32, i32
  }
  func.func @transform_3(%arg0: i32, %arg1: i32) -> (i32, i32) {
    %c1_i32 = arith.constant 1 : i32
    %0 = arith.muli %arg0, %c1_i32 : i32
    %1 = arith.addi %0, %arg1 : i32
    %c0_i32 = arith.constant 0 : i32
    %2 = arith.minsi %1, %c0_i32 : i32
    %c0_i32_0 = arith.constant 0 : i32
    %c0_i32_1 = arith.constant 0 : i32
    return %2, %c0_i32_0 : i32, i32
  }
  func.func @transform_4(%arg0: i32, %arg1: i32) -> (i32, i32, i32) {
    %c0_i32 = arith.constant 0 : i32
    %c0_i32_0 = arith.constant 0 : i32
    %c0_i32_1 = arith.constant 0 : i32
    return %arg0, %c0_i32, %c0_i32_0 : i32, i32, i32
  }
  func.func @transform_5(%arg0: i32, %arg1: i32) -> (i32, i32, i32) {
    %c0_i32 = arith.constant 0 : i32
    %c0_i32_0 = arith.constant 0 : i32
    %c0_i32_1 = arith.constant 0 : i32
    return %arg0, %c0_i32, %c0_i32_0 : i32, i32, i32
  }
}

</mosaic_0001>

<bundles_post_ra>
// kernel: mse_multi.1
= control target key start
LH: loop header
LB: loop body
LE: loop exit
PB: predicated region body
PF: predicated region fallthrough
CT: control target
= control target key end

     0   :  { %s644_s18 = smov 0   ;;  %s646_s19 = smov 0   ;;  %s706_s0 = inlined_call_operand.vmem [shape: f32[16,128], index: 0, kind: input, shape index: {}]   ;;  %s707_s1 = inlined_call_operand.vmem [shape: f32[16,128], index: 1, kind: input, shape index: {}]   ;;  %s708_s2 = inlined_call_operand.vmem [shape: f32[8,128], index: 2, kind: input, shape index: {}]   ;;  %s709_s3 = inlined_call_operand.vmem [shape: f32[8,128], index: 3, kind: input, shape index: {}]   ;;  %s710_s4 = inlined_call_operand.vmem [shape: f32[2,1,128], index: 4, kind: output, shape index: {0}]   ;;  %s711_s5 = inlined_call_operand.vmem [shape: f32[2,1,128], index: 5, kind: output, shape index: {1}]  }
   0x1   :  { %s648_s20 = smov 0  }
   0x2 LB: > { %s28_s21 = sadd.s32 1, %s607_s19  ;;  %p548_p0 = scmp.ge.s32.totalorder %s611_s20, 1  ;;  %s611_s20 = sphi %s648_s20, %s16_s20   ;;  %s607_s19 = sphi %s646_s19, %s713_s19   ;;  %s603_s18 = sphi %s644_s18, %s712_s18  }
   0x3   : > { %p30_p1 = scmp.ge.s32.totalorder %s28_s21, 2  ;;  %p280_p2 = scmp.lt.s32.totalorder %s611_s20, 3 }
   0x5   : > { %s715_s21 = smov (%p30_p1, %s28_s21), 0  ;;  %p281_p3 = pnand %p548_p0, %p280_p2 }
   0x6   : > { %p335_p4 = scmp.lt.s32.totalorder (!%p281_p3), %s603_s18, 0  ;;  %p378_p5 = scmp.lt.s32.totalorder (!%p281_p3), %s603_s18, 1 }
   0x7   : > { %284 = sbr.rel (%p281_p3) target bundleno = 48 (0x30), region = 36  ;;  %p561_p7 = scmp.ge.s32.totalorder (!%p281_p3), %s603_s18, 1 }
   0xc   : > { %s336_s22 = scalar_select %p335_p4, %s603_s18, 0  ;;  %v613_v0 = vmov 0.0  }
   0xd   : > { %s379_s23 = scalar_select %p378_p5, %s603_s18, 1 }
   0xe   : > { %s549_s24 = sshll.u32 %s336_s22, 1  ;;  %s717_s22 = smov (!%p335_p4, %s336_s22), 0 }
   0xf   : > { %p338_p6 = scmp.lt.s32.totalorder %s549_s24, 1  ;;  %s671_s27 = scalar_lea.vmem %s710_s4, %s379_s23 }
  0x10   : > { %389 = vst [vmem:[%s671_s27] sm:$0x1] %v613_v0  ;;  %s556_s28 = sshll.u32 %s717_s22, 3  ;;  %s677_s6 = scalar_lea.vmem %s711_s5, %s379_s23 }
  0x11   : > { %s719_s24 = smov (!%p338_p6, %s549_s24), 1  ;;  %s364_s10 = scalar_lea.vmem %s708_s2, %s556_s28  ;;  %390 = vst [vmem:[%s677_s6] sm:$0x1] %v613_v0 }
  0x12   : > { %s550_s7 = sshll.u32 %s719_s24, 3  ;;  %s374_s23 = scalar_lea.vmem %s709_s3, %s556_s28 }
  0x13   : > { %s341_s13 = scalar_lea.vmem %s706_s0, %s550_s7  ;;  %s353_s16 = scalar_lea.vmem %s707_s1, %s550_s7 }
  0x14   : > { %394 = sbr.rel (%p561_p7) target bundleno = 48 (0x30), region = 44 }
  0x19   : > { %v396_v1 = vld [vmem:[%s341_s13] sm:$0xff]  ;;  %v397_v2 = vld [vmem:[%s341_s13 + $0x8] sm:$0xff] }
  0x1a   : > { %v398_v3 = vld [vmem:[%s353_s16] sm:$0xff]  ;;  %v399_v4 = vld [vmem:[%s353_s16 + $0x8] sm:$0xff] }
  0x1b   : > { %v400_v5 = vsub.f32 %v396_v1, %v398_v3  ;;  %v401_v6 = vsub.f32 %v397_v2, %v399_v4  ;;  %v415_v7 = vld [vmem:[%s364_s10] sm:$0xff] }
  0x1c   : > { %v416_v8 = vld [vmem:[%s374_s23] sm:$0xff] }
  0x1d   : > { %v417_v9 = vsub.f32 %v415_v7, %v416_v8  ;;  %v402_v10 = vmul.f32 %v400_v5, %v400_v5  ;;  %v403_v11 = vmul.f32 %v401_v6, %v401_v6  ;;  %v414_v24 = vld [vmem:[%s677_s6] sm:$0x1] }
  0x1e   : > { %v395_v25 = vld [vmem:[%s671_s27] sm:$0x1] }
  0x1f   : > { %v418_v12 = vmul.f32 %v417_v9, %v417_v9  ;;  %v404_v13 = vadd.f32 %v403_v11, %v402_v10 }
  0x21   : > { %v419_v14 = vrot.slane %v418_v12, 4  ;;  %v405_v15 = vrot.slane %v404_v13, 4 }
  0x23   : > { %v420_v16 = vadd.f32 %v419_v14, %v418_v12  ;;  %v406_v17 = vadd.f32 %v405_v15, %v404_v13 }
  0x25   : > { %v421_v18 = vrot.slane %v420_v16, 2  ;;  %v407_v19 = vrot.slane %v406_v17, 2 }
  0x27   : > { %v422_v20 = vadd.f32 %v421_v18, %v420_v16  ;;  %v408_v21 = vadd.f32 %v407_v19, %v406_v17 }
  0x29   : > { %v423_v22 = vrot.slane %v422_v20, 1  ;;  %v409_v23 = vrot.slane %v408_v21, 1 }
  0x2b   : > { %v424_v26 = vadd.f32 %v423_v22, %v422_v20  ;;  %v410_v27 = vadd.f32 %v409_v23, %v408_v21 }
  0x2d   : > { %v426_v28 = vadd.f32 %v424_v26, %v414_v24  ;;  %v412_v29 = vadd.f32 %v410_v27, %v395_v25 }
  0x2f   : > { %427 = vst [vmem:[%s677_s6] sm:$0x1] %v426_v28  ;;  %413 = vst [vmem:[%s671_s27] sm:$0x1] %v412_v29 }
  0x30 PF: > { %s16_s20 = sadd.s32 1, %s611_s20   ;;  %s712_s18 = smov %s607_s19 }
  0x31   : > { %p13_p8 = scmp.ge.s32.totalorder %s16_s20, 4   ;;  %s713_s19 = smov %s715_s21 }
  0x33   :  { %15 = sbr.rel (!%p13_p8) target bundleno = 2 (0x2), region = 95 }

</bundles_post_ra>
